<compile_context>
chip_gen: v5e
topology: v5e:2x2
jax: 0.10.0
libtpu: 0.0.40
codegen_flags: <defaults>
</compile_context>

<pallas_src>
import functools
import math

import jax
import jax.numpy as jnp
from jax import lax
from jax.experimental import pallas as pl
from jax.experimental.pallas import tpu as pltpu


# ---------------------- per-generation VMEM / tile budget ---------------------- #

def _vmem_capacity_bytes():
    try:
        info = pltpu.get_tpu_info()
        cap = getattr(info, "vmem_capacity_bytes", None)
        if cap:
            return int(cap)
    except Exception:
        pass
    return 64 * 1024 * 1024            # conservative default (v7x per-core VMEM)


_VMEM_CAP = _vmem_capacity_bytes()
VMEM_LIMIT = min((_VMEM_CAP * 3) // 4, 96 * 1024 * 1024)   # ~96 MiB v5e/v6e, ~48 MiB v7x
_BIG_VMEM = _VMEM_CAP >= 96 * 1024 * 1024
TM_TARGET = 512 if _BIG_VMEM else 256     # row tile
TK_TARGET = 512                           # contraction tile
TN_TARGET = 512                           # output-feature tile
KV_TILE_TARGET = 512                      # attention kv-length tile


def _round_up(x, m):
    return (x + m - 1) // m * m


def _pow2_floor(x):
    return 1 << (max(int(x), 1).bit_length() - 1)


def _pick_tile(dim, target):
    """Largest power-of-two tile <= target (>=128) dividing dim, else the full dim."""
    t = target
    while t >= 128:
        if dim % t == 0:
            return t
        t //= 2
    return dim          # small / odd dims: single full-width block (lane dim == full dim)


# -------------------------------- Pallas kernels -------------------------------- #

def _linear_kernel(x_ref, w_ref, b_ref, o_ref, acc_ref):
    # y = x @ W + b ; grid = (M/tm, N/tn, K/tk), k is the (arbitrary) reduction axis.
    k = pl.program_id(2)

    @pl.when(k == 0)
    def _():
        acc_ref[...] = jnp.zeros_like(acc_ref)

    acc_ref[...] += jnp.dot(x_ref[...].astype(jnp.bfloat16), w_ref[...],
                            preferred_element_type=jnp.float32)

    @pl.when(k == pl.num_programs(2) - 1)
    def _():
        o_ref[...] = (acc_ref[...] + b_ref[...]).astype(o_ref.dtype)


def _linear_add_ln_kernel(x_ref, w_ref, b_ref, r_ref, g_ref, beta_ref, o_ref, acc_ref):
    # out = LayerNorm(residual + x @ W + b); grid = (M/tm, K/tk)
    k = pl.program_id(1)

    @pl.when(k == 0)
    def _():
        acc_ref[...] = jnp.zeros_like(acc_ref)

    acc_ref[...] += jnp.dot(x_ref[...].astype(jnp.bfloat16), w_ref[...],
                            preferred_element_type=jnp.float32)

    @pl.when(k == pl.num_programs(1) - 1)
    def _():
        y = acc_ref[...] + b_ref[...] + r_ref[...]
        mu = jnp.mean(y, axis=-1, keepdims=True)
        var = jnp.mean(y * y, axis=-1, keepdims=True) - mu * mu   # one-pass LN stats
        o_ref[...] = ((y - mu) * lax.rsqrt(var + 1e-5) * g_ref[...]
                      + beta_ref[...]).astype(o_ref.dtype)


def _ffn_add_ln_kernel(x_ref, w1_ref, b1_ref, w2_ref, b2_ref, g_ref, beta_ref,
                       o_ref, acc_ref):
    # out = LayerNorm(x + relu(x@W1+b1)@W2 + b2); grid = (M/tm, F/tf)
    # The (rows, ffn) hidden activation never leaves VMEM.
    f = pl.program_id(1)

    @pl.when(f == 0)
    def _():
        acc_ref[...] = jnp.zeros_like(acc_ref)

    x_bf = x_ref[...].astype(jnp.bfloat16)
    h = jnp.dot(x_bf, w1_ref[...], preferred_element_type=jnp.float32) + b1_ref[...]
    h = jnp.maximum(h, 0.0)
    acc_ref[...] += jnp.dot(h.astype(jnp.bfloat16), w2_ref[...],
                            preferred_element_type=jnp.float32)

    @pl.when(f == pl.num_programs(1) - 1)
    def _():
        y = acc_ref[...] + b2_ref[...] + x_ref[...]         # residual = kernel input (f32)
        mu = jnp.mean(y, axis=-1, keepdims=True)
        var = jnp.mean(y * y, axis=-1, keepdims=True) - mu * mu
        o_ref[...] = ((y - mu) * lax.rsqrt(var + 1e-5) * g_ref[...]
                      + beta_ref[...]).astype(o_ref.dtype)


def _attn_body(q_ref, k_ref, v_ref, mask, o_ref, m_sc, l_sc, acc_sc, *, nheads):
    # Flash / online-softmax over the kv-block grid axis.
    # q_ref: (T, E) bf16 (one batch), k_ref/v_ref: (ts, E) bf16, o_ref: (T, E) bf16.
    sb = pl.program_id(1)

    @pl.when(sb == 0)
    def _():
        m_sc[...] = jnp.full_like(m_sc, -jnp.inf)
        l_sc[...] = jnp.zeros_like(l_sc)
        acc_sc[...] = jnp.zeros_like(acc_sc)

    e = q_ref.shape[1]
    d = e // nheads

    for h in range(nheads):                                  # heads stay in VMEM lanes
        cs = slice(h * d, (h + 1) * d)
        q_h = q_ref[:, cs]                                   # (T, d)  bf16 (scale pre-folded)
        k_h = k_ref[:, cs]                                   # (ts, d) bf16
        v_h = v_ref[:, cs]                                   # (ts, d) bf16
        s = lax.dot_general(q_h, k_h, (((1,), (1,)), ((), ())),
                            preferred_element_type=jnp.float32)          # (T, ts) f32
        if mask is not None:
            s = s + mask
        hs = slice(h, h + 1)
        m_prev = m_sc[:, hs]                                 # (T, 1)
        m_new = jnp.maximum(m_prev, jnp.max(s, axis=-1, keepdims=True))
        alpha = jnp.exp(m_prev - m_new)
        p = jnp.exp(s - m_new)
        l_sc[:, hs] = alpha * l_sc[:, hs] + jnp.sum(p, axis=-1, keepdims=True)
        acc_sc[:, cs] = alpha * acc_sc[:, cs] + jnp.dot(
            p.astype(jnp.bfloat16), v_h, preferred_element_type=jnp.float32)
        m_sc[:, hs] = m_new

    @pl.when(sb == pl.num_programs(1) - 1)
    def _():
        for h in range(nheads):
            cs = slice(h * d, (h + 1) * d)
            inv = pl.reciprocal(l_sc[:, h:h + 1], approx=True)
            o_ref[:, cs] = (acc_sc[:, cs] * inv).astype(o_ref.dtype)


def _attn_kernel(q_ref, k_ref, v_ref, o_ref, m_sc, l_sc, acc_sc, *, nheads):
    _attn_body(q_ref, k_ref, v_ref, None, o_ref, m_sc, l_sc, acc_sc, nheads=nheads)


def _attn_mask_kernel(q_ref, k_ref, v_ref, mask_ref, o_ref, m_sc, l_sc, acc_sc, *, nheads):
    _attn_body(q_ref, k_ref, v_ref, mask_ref[...], o_ref, m_sc, l_sc, acc_sc, nheads=nheads)


# -------------------------------- Pallas wrappers -------------------------------- #

def pallas_linear(x, w, b, out_dtype=jnp.bfloat16):
    """Tiled, pipelined y = x @ W + b (bf16 MXU, f32 accumulate)."""
    m, kdim = x.shape
    n = w.shape[1]
    tm = min(TM_TARGET, _round_up(m, 8))
    tk = _pick_tile(kdim, TK_TARGET)
    tn = _pick_tile(n, TN_TARGET)
    grid = (pl.cdiv(m, tm), n // tn, kdim // tk)
    ce = pl.CostEstimate(
        flops=2 * m * n * kdim, transcendentals=0,
        bytes_accessed=int(m * kdim * x.dtype.itemsize + kdim * n * 2
                           + m * n * jnp.dtype(out_dtype).itemsize))
    return pl.pallas_call(
        _linear_kernel,
        out_shape=jax.ShapeDtypeStruct((m, n), out_dtype),
        grid=grid,
        in_specs=[pl.BlockSpec((tm, tk), lambda i, j, k: (i, k)),
                  pl.BlockSpec((tk, tn), lambda i, j, k: (k, j)),
                  pl.BlockSpec((1, tn), lambda i, j, k: (0, j))],
        out_specs=pl.BlockSpec((tm, tn), lambda i, j, k: (i, j)),
        scratch_shapes=[pltpu.VMEM((tm, tn), jnp.float32)],
        compiler_params=pltpu.CompilerParams(
            dimension_semantics=("parallel", "parallel", "arbitrary"),
            vmem_limit_bytes=VMEM_LIMIT),
        cost_estimate=ce,
    )(x, w, b.reshape(1, n).astype(jnp.float32))


def pallas_linear_add_ln(x, w, b, resid, gamma, beta):
    """LayerNorm(resid + x @ W + b) — matmul fused with residual add + LN epilogue."""
    m, kdim = x.shape
    e = w.shape[1]
    tm = min(TM_TARGET, _round_up(m, 8))
    tk = _pick_tile(kdim, TK_TARGET)
    grid = (pl.cdiv(m, tm), kdim // tk)
    ce = pl.CostEstimate(flops=2 * m * e * kdim, transcendentals=0,
                         bytes_accessed=int(m * kdim * x.dtype.itemsize + kdim * e * 2
                                            + 2 * m * e * 4))
    return pl.pallas_call(
        _linear_add_ln_kernel,
        out_shape=jax.ShapeDtypeStruct((m, e), jnp.float32),
        grid=grid,
        in_specs=[pl.BlockSpec((tm, tk), lambda i, k: (i, k)),
                  pl.BlockSpec((tk, e), lambda i, k: (k, 0)),
                  pl.BlockSpec((1, e), lambda i, k: (0, 0)),
                  pl.BlockSpec((tm, e), lambda i, k: (i, 0)),
                  pl.BlockSpec((1, e), lambda i, k: (0, 0)),
                  pl.BlockSpec((1, e), lambda i, k: (0, 0))],
        out_specs=pl.BlockSpec((tm, e), lambda i, k: (i, 0)),
        scratch_shapes=[pltpu.VMEM((tm, e), jnp.float32)],
        compiler_params=pltpu.CompilerParams(
            dimension_semantics=("parallel", "arbitrary"),
            vmem_limit_bytes=VMEM_LIMIT),
        cost_estimate=ce,
    )(x, w, b.reshape(1, e).astype(jnp.float32), resid,
      gamma.reshape(1, e), beta.reshape(1, e))


def pallas_ffn_add_ln(x, w1, b1, w2, b2, gamma, beta):
    """LayerNorm(x + relu(x@W1+b1)@W2 + b2), tiled over ffn_dim, hidden kept in VMEM."""
    m, e = x.shape
    fdim = w1.shape[1]
    tm = min(TM_TARGET, _round_up(m, 8))
    # ffn tile sized from the VMEM budget: streamed w1 (e,tf) + w2 (tf,e) bf16 tiles are
    # double-buffered -> ~8*e bytes of weight VMEM per ffn column.
    tf_target = min(1024, max(128, _pow2_floor((VMEM_LIMIT // 2) // (8 * e))))
    tf = _pick_tile(fdim, tf_target)
    grid = (pl.cdiv(m, tm), fdim // tf)
    ce = pl.CostEstimate(flops=4 * m * e * fdim, transcendentals=0,
                         bytes_accessed=int(2 * m * e * 4 + 2 * e * fdim * 2 + m * e * 4))
    return pl.pallas_call(
        _ffn_add_ln_kernel,
        out_shape=jax.ShapeDtypeStruct((m, e), jnp.float32),
        grid=grid,
        in_specs=[pl.BlockSpec((tm, e), lambda i, f: (i, 0)),
                  pl.BlockSpec((e, tf), lambda i, f: (0, f)),
                  pl.BlockSpec((1, tf), lambda i, f: (0, f)),
                  pl.BlockSpec((tf, e), lambda i, f: (f, 0)),
                  pl.BlockSpec((1, e), lambda i, f: (0, 0)),
                  pl.BlockSpec((1, e), lambda i, f: (0, 0)),
                  pl.BlockSpec((1, e), lambda i, f: (0, 0))],
        out_specs=pl.BlockSpec((tm, e), lambda i, f: (i, 0)),
        scratch_shapes=[pltpu.VMEM((tm, e), jnp.float32)],
        compiler_params=pltpu.CompilerParams(
            dimension_semantics=("parallel", "arbitrary"),
            vmem_limit_bytes=VMEM_LIMIT),
        cost_estimate=ce,
    )(x, w1, b1.reshape(1, fdim).astype(jnp.float32), w2,
      b2.reshape(1, e).astype(jnp.float32), gamma.reshape(1, e), beta.reshape(1, e))


def pallas_attention(q_arr, k_arr, v_arr, mask, *, nheads, e, seq_q, seq_kv, batch,
                     q_col, k_col, v_col):
    """Batch-major flash attention.

    q_arr: (batch*seq_q, *) bf16 with q at column block `q_col` (width e);
    k_arr/v_arr: (batch*seq_kv, *) bf16 with k/v at column blocks `k_col`/`v_col`.
    mask: optional additive (seq_q, seq_kv) f32.  Returns merged-head (batch*seq_q, e) bf16.
    """
    assert batch == 1 or seq_q % 8 == 0, "seq_q must be a multiple of 8 when batch > 1"
    d = e // nheads
    ts = _pick_tile(seq_kv, KV_TILE_TARGET)
    assert batch == 1 or ts % 8 == 0, "kv length must be a multiple of 8 when batch > 1"
    nks = seq_kv // ts
    grid = (batch, nks)

    in_specs = [
        pl.BlockSpec((seq_q, e), lambda n, s: (n, q_col)),
        pl.BlockSpec((ts, e), lambda n, s: (n * nks + s, k_col)),
        pl.BlockSpec((ts, e), lambda n, s: (n * nks + s, v_col)),
    ]
    args = [q_arr, k_arr, v_arr]
    if mask is not None:
        in_specs.append(pl.BlockSpec((seq_q, ts), lambda n, s: (0, s)))
        args.append(mask.astype(jnp.float32))
        kern = functools.partial(_attn_mask_kernel, nheads=nheads)
    else:
        kern = functools.partial(_attn_kernel, nheads=nheads)   # no zero-mask DMA

    ce = pl.CostEstimate(flops=4 * batch * nheads * seq_q * seq_kv * d,
                         transcendentals=batch * nheads * seq_q * seq_kv,
                         bytes_accessed=int(2 * (batch * seq_q * e + 2 * batch * seq_kv * e)))
    return pl.pallas_call(
        kern,
        out_shape=jax.ShapeDtypeStruct((batch * seq_q, e), jnp.bfloat16),
        grid=grid,
        in_specs=in_specs,
        out_specs=pl.BlockSpec((seq_q, e), lambda n, s: (n, 0)),    # lane-dense merged heads
        scratch_shapes=[pltpu.VMEM((seq_q, nheads), jnp.float32),   # running max
                        pltpu.VMEM((seq_q, nheads), jnp.float32),   # running denom
                        pltpu.VMEM((seq_q, e), jnp.float32)],       # running acc
        compiler_params=pltpu.CompilerParams(
            dimension_semantics=("parallel", "arbitrary"),
            vmem_limit_bytes=VMEM_LIMIT),
        cost_estimate=ce,
    )(*args)


# --------------------------------- model (JAX glue) -------------------------------- #

def attention_sublayer(x_q, x_kv, resid, p, ln_g, ln_b, nheads, attn_mask,
                       self_attn, seq_q, seq_kv, batch):
    """LayerNorm(resid + MHA(x_q, x_kv, x_kv)) on batch-major (rows, E) activations."""
    e = resid.shape[1]
    zero_copy = (e % 128 == 0)          # q/k/v column blocks must be lane-tile aligned

    if self_attn:
        qkv = pallas_linear(x_q, p["in_proj_w"], p["in_proj_b"])      # (rows, 3E) bf16
        if zero_copy:
            o = pallas_attention(qkv, qkv, qkv, attn_mask, nheads=nheads, e=e,
                                 seq_q=seq_q, seq_kv=seq_kv, batch=batch,
                                 q_col=0, k_col=1, v_col=2)
        else:   # small/odd d_model fallback: explicit slices (extra copies, small sizes only)
            q, k, v = qkv[:, :e], qkv[:, e:2 * e], qkv[:, 2 * e:]
            o = pallas_attention(q, k, v, attn_mask, nheads=nheads, e=e,
                                 seq_q=seq_q, seq_kv=seq_kv, batch=batch,
                                 q_col=0, k_col=0, v_col=0)
    else:
        q = pallas_linear(x_q, p["q_proj_w"], p["q_proj_b"])          # (rows_q, E) bf16
        kv = pallas_linear(x_kv, p["kv_proj_w"], p["kv_proj_b"])      # (rows_kv, 2E) bf16
        if zero_copy:
            o = pallas_attention(q, kv, kv, attn_mask, nheads=nheads, e=e,
                                 seq_q=seq_q, seq_kv=seq_kv, batch=batch,
                                 q_col=0, k_col=0, v_col=1)
        else:
            k, v = kv[:, :e], kv[:, e:]
            o = pallas_attention(q, k, v, attn_mask, nheads=nheads, e=e,
                                 seq_q=seq_q, seq_kv=seq_kv, batch=batch,
                                 q_col=0, k_col=0, v_col=0)

    # out-projection fused with residual-add + LayerNorm (o is already merged-head layout)
    return pallas_linear_add_ln(o, p["out_proj_w"], p["out_proj_b"], resid, ln_g, ln_b)


def transformer_decoder_layer_fwd(tgt, memory, p, nhead, tgt_mask=None, memory_mask=None):
    """Post-norm torch TransformerDecoderLayer forward (dropout = identity)."""
    t, n, e = tgt.shape
    s = memory.shape[0]
    if tgt_mask is not None and tgt_mask.ndim > 2:
        tgt_mask = tgt_mask[0]
    if memory_mask is not None and memory_mask.ndim > 2:
        memory_mask = memory_mask[0]

    # batch-major residual stream: one transpose in / one out for the whole layer.
    x = tgt.transpose(1, 0, 2).reshape(n * t, e)           # (N*T, E) f32
    mem = memory.transpose(1, 0, 2).reshape(n * s, e)      # (N*S, E) f32

    # self-attn + add & norm1
    x = attention_sublayer(x, x, x, p["self_attn"], p["ln1_g"], p["ln1_b"],
                           nhead, tgt_mask, True, t, t, n)
    # cross-attn + add & norm2
    x = attention_sublayer(x, mem, x, p["cross_attn"], p["ln2_g"], p["ln2_b"],
                           nhead, memory_mask, False, t, s, n)
    # FFN + add & norm3 (fully fused; hidden activation never hits HBM)
    out = pallas_ffn_add_ln(x, p["ffn_w1"], p["ffn_b1"], p["ffn_w2"], p["ffn_b2"],
                            p["ln3_g"], p["ln3_b"])
    return out.reshape(n, t, e).transpose(1, 0, 2)


# --------------------------------- parameter init --------------------------------- #

def _xavier(key, shape):
    fan_in, fan_out = shape
    lim = math.sqrt(6.0 / (fan_in + fan_out))
    return jax.random.uniform(key, shape, jnp.float32, -lim, lim)


def init_layer_params(key, e, ffn, nhead):
    """Weights stored (in, out), matmul weights in bf16, 1/sqrt(d) folded into Q proj."""
    ks = jax.random.split(key, 4)
    d = e // nhead
    scale = 1.0 / math.sqrt(d)

    def _attn_weights(k):
        k1, k2 = jax.random.split(k)
        w_in = _xavier(k1, (e, 3 * e))
        b_in = jnp.zeros((3 * e,), jnp.float32)
        # fold the 1/sqrt(head_dim) attention scale into the Q projection once, at init
        w_in = w_in.at[:, :e].multiply(scale)
        b_in = b_in.at[:e].multiply(scale)
        w_out = _xavier(k2, (e, e))
        return w_in, b_in, w_out

    w_in, b_in, w_out = _attn_weights(ks[0])
    self_attn = {"in_proj_w": w_in.astype(jnp.bfloat16),
                 "in_proj_b": b_in,
                 "out_proj_w": w_out.astype(jnp.bfloat16),
                 "out_proj_b": jnp.zeros((e,), jnp.float32)}

    w_in, b_in, w_out = _attn_weights(ks[1])
    cross_attn = {"q_proj_w": w_in[:, :e].astype(jnp.bfloat16),
                  "q_proj_b": b_in[:e],
                  "kv_proj_w": w_in[:, e:].astype(jnp.bfloat16),
                  "kv_proj_b": b_in[e:],
                  "out_proj_w": w_out.astype(jnp.bfloat16),
                  "out_proj_b": jnp.zeros((e,), jnp.float32)}

    return {
        "self_attn": self_attn,
        "cross_attn": cross_attn,
        "ffn_w1": _xavier(ks[2], (e, ffn)).astype(jnp.bfloat16),
        "ffn_b1": jnp.zeros((ffn,), jnp.float32),
        "ffn_w2": _xavier(ks[3], (ffn, e)).astype(jnp.bfloat16),
        "ffn_b2": jnp.zeros((e,), jnp.float32),
        "ln1_g": jnp.ones((e,), jnp.float32), "ln1_b": jnp.zeros((e,), jnp.float32),
        "ln2_g": jnp.ones((e,), jnp.float32), "ln2_b": jnp.zeros((e,), jnp.float32),
        "ln3_g": jnp.ones((e,), jnp.float32), "ln3_b": jnp.zeros((e,), jnp.float32),
    }


# -------------------------------------- main --------------------------------------- #

if __name__ == "__main__":
    T, S, N, E = 8, 16, 2, 128       # tgt len, memory len, batch, d_model
    NHEAD, FFN = 4, 256              # head_dim = 32

    root = jax.random.PRNGKey(0)
    k_p, k_t, k_m = jax.random.split(root, 3)
    params = init_layer_params(k_p, E, FFN, NHEAD)

    tgt = jax.random.normal(k_t, (T, N, E), jnp.float32)
    memory = jax.random.normal(k_m, (S, N, E), jnp.float32)

    # causal tgt mask (additive), like torch generate_square_subsequent_mask
    tgt_mask = jnp.where(jnp.tril(jnp.ones((T, T), bool)), 0.0, -1e9).astype(jnp.float32)

    out = transformer_decoder_layer_fwd(tgt, memory, params, NHEAD,
                                        tgt_mask=tgt_mask, memory_mask=None)
    out = jax.block_until_ready(out)
    assert out.shape == (T, N, E), out.shape
    assert bool(jnp.all(jnp.isfinite(out)))
    print("KERNEL_OK")
</pallas_src>

<mosaic_0001>
module attributes {stable_mosaic.version = 11 : i64} {
  func.func @_linear_kernel(%arg0: i32, %arg1: i32, %arg2: i32, %arg3: memref<16x128xf32, #tpu.memory_space<vmem>>, %arg4: memref<128x128xbf16, #tpu.memory_space<vmem>>, %arg5: memref<1x128xf32, #tpu.memory_space<vmem>>, %arg6: memref<16x128xbf16, #tpu.memory_space<vmem>>, %arg7: memref<16x128xf32, #tpu.memory_space<vmem>>) attributes {dimension_semantics = [#tpu.dimension_semantics<parallel>, #tpu.dimension_semantics<parallel>, #tpu.dimension_semantics<arbitrary>], iteration_bounds = array<i64: 1, 3, 1>, scalar_prefetch = 0 : i64, scratch_operands = 1 : i64, tpu.core_type = #tpu.core_type<tc>, window_params = [{transform_indices = @transform_0, window_bounds = array<i64: 16, 128>}, {transform_indices = @transform_1, window_bounds = array<i64: 128, 128>}, {transform_indices = @transform_2, window_bounds = array<i64: 1, 128>}, {transform_indices = @transform_3, window_bounds = array<i64: 16, 128>}]} {
    %c0_i32 = arith.constant 0 : i32
    %0 = arith.cmpi eq, %arg2, %c0_i32 : i32
    %1 = arith.extui %0 : i1 to i32
    %c0_i32_0 = arith.constant 0 : i32
    %2 = arith.cmpi ne, %1, %c0_i32_0 : i32
    scf.if %2 {
      %cst_10 = arith.constant 0.000000e+00 : f32
      %13 = vector.broadcast %cst_10 : f32 to vector<16x128xf32>
      %c0_11 = arith.constant 0 : index
      %c0_12 = arith.constant 0 : index
      %14 = vector.load %arg7[%c0_11, %c0_12] : memref<16x128xf32, #tpu.memory_space<vmem>>, vector<16x128xf32>
      tpu.vector_store %arg7[%c0_11, %c0_12], %13 {strides = array<i32>} : memref<16x128xf32, #tpu.memory_space<vmem>>, vector<16x128xf32>,
    } else {
    }
    %c0 = arith.constant 0 : index
    %c0_1 = arith.constant 0 : index
    %3 = vector.load %arg7[%c0, %c0_1] : memref<16x128xf32, #tpu.memory_space<vmem>>, vector<16x128xf32>
    %c0_2 = arith.constant 0 : index
    %c0_3 = arith.constant 0 : index
    %4 = vector.load %arg3[%c0_2, %c0_3] : memref<16x128xf32, #tpu.memory_space<vmem>>, vector<16x128xf32>
    %5 = arith.truncf %4 : vector<16x128xf32> to vector<16x128xbf16>
    %c0_4 = arith.constant 0 : index
    %c0_5 = arith.constant 0 : index
    %6 = vector.load %arg4[%c0_4, %c0_5] : memref<128x128xbf16, #tpu.memory_space<vmem>>, vector<128x128xbf16>
    %cst = arith.constant dense<0.000000e+00> : vector<16x128xf32>
    %7 = tpu.matmul %5, %6, %cst {dimension_numbers = #tpu.dot_dimension_numbers<[1], [0], [0], [1], [0, 0, 1, 1], [], []>} : vector<16x128xbf16>, vector<128x128xbf16>, vector<16x128xf32> -> vector<16x128xf32>
    %8 = arith.addf %3, %7 : vector<16x128xf32>
    %c0_6 = arith.constant 0 : index
    %c0_7 = arith.constant 0 : index
    %9 = vector.load %arg7[%c0_6, %c0_7] : memref<16x128xf32, #tpu.memory_space<vmem>>, vector<16x128xf32>
    tpu.vector_store %arg7[%c0_6, %c0_7], %8 {strides = array<i32>} : memref<16x128xf32, #tpu.memory_space<vmem>>, vector<16x128xf32>,
    %c0_i32_8 = arith.constant 0 : i32
    %10 = arith.cmpi eq, %arg2, %c0_i32_8 : i32
    %11 = arith.extui %10 : i1 to i32
    %c0_i32_9 = arith.constant 0 : i32
    %12 = arith.cmpi ne, %11, %c0_i32_9 : i32
    scf.if %12 {
      %c0_10 = arith.constant 0 : index
      %c0_11 = arith.constant 0 : index
      %13 = vector.load %arg7[%c0_10, %c0_11] : memref<16x128xf32, #tpu.memory_space<vmem>>, vector<16x128xf32>
      %c0_12 = arith.constant 0 : index
      %c0_13 = arith.constant 0 : index
      %14 = vector.load %arg5[%c0_12, %c0_13] : memref<1x128xf32, #tpu.memory_space<vmem>>, vector<1x128xf32>
      %15 = vector.broadcast %14 : vector<1x128xf32> to vector<16x128xf32>
      %16 = arith.addf %13, %15 : vector<16x128xf32>
      %17 = arith.truncf %16 : vector<16x128xf32> to vector<16x128xbf16>
      %c0_14 = arith.constant 0 : index
      %c0_15 = arith.constant 0 : index
      %18 = vector.load %arg6[%c0_14, %c0_15] : memref<16x128xbf16, #tpu.memory_space<vmem>>, vector<16x128xbf16>
      tpu.vector_store %arg6[%c0_14, %c0_15], %17 {strides = array<i32>} : memref<16x128xbf16, #tpu.memory_space<vmem>>, vector<16x128xbf16>,
    } else {
    }
    return
  }
  func.func @transform_0(%arg0: i32, %arg1: i32, %arg2: i32) -> (i32, i32) {
    %c0_i32 = arith.constant 0 : i32
    return %arg0, %arg2 : i32, i32
  }
  func.func @transform_1(%arg0: i32, %arg1: i32, %arg2: i32) -> (i32, i32) {
    %c0_i32 = arith.constant 0 : i32
    return %arg2, %arg1 : i32, i32
  }
  func.func @transform_2(%arg0: i32, %arg1: i32, %arg2: i32) -> (i32, i32) {
    %c0_i32 = arith.constant 0 : i32
    %c0_i32_0 = arith.constant 0 : i32
    return %c0_i32, %arg1 : i32, i32
  }
  func.func @transform_3(%arg0: i32, %arg1: i32, %arg2: i32) -> (i32, i32) {
    %c0_i32 = arith.constant 0 : i32
    return %arg0, %arg1 : i32, i32
  }
}

</mosaic_0001>

<bundles_post_ra>
// kernel: tpu_custom_call.1
= control target key start
LH: loop header
LB: loop body
LE: loop exit
PB: predicated region body
PF: predicated region fallthrough
CT: control target
= control target key end

     0   :  { %8 = vsyncpa [#allocation4], 0  ;;  %s1051_s0 = inlined_call_operand.hbm [shape: f32[16,128], index: 0, kind: input, shape index: {}]   ;;  %s1052_s1 = inlined_call_operand.hbm [shape: bf16[128,384], index: 1, kind: input, shape index: {}]   ;;  %s1053_s2 = inlined_call_operand.hbm [shape: f32[1,384], index: 2, kind: input, shape index: {}]   ;;  %s1054_s3 = inlined_call_operand.hbm [shape: bf16[16,384], index: 3, kind: output, shape index: {}]  }
   0x1   :  { %9 = vsyncpa [#allocation7], 0 }
   0x2   :  { %11 = vsyncpa [#allocation7 + $0x1], 0 }
   0x3   :  { %12 = vsyncpa [#allocation5], 0 }
   0x4   :  { %14 = vsyncpa [#allocation5 + $0x1], 0  ;;  %s879_s12 = smov 0   ;;  %s881_s13 = smov 0  }
   0x5   :  { %s883_s14 = smov 0   ;;  %s885_s15 = smov 0  }
   0x6   :  { %s887_s16 = smov 0   ;;  %s889_s17 = smov 0  }
   0x7 LB: > { %s35_s18 = sadd.s32 1, %s844_s16  ;;  %s76_s19 = sadd.s32 1, %s836_s14  ;;  %s848_s17 = sphi %s889_s17, %s20_s17   ;;  %s844_s16 = sphi %s887_s16, %s1065_s16   ;;  %s840_s15 = sphi %s885_s15, %s1064_s15   ;;  %s836_s14 = sphi %s883_s14, %s1063_s14   ;;  %s832_s13 = sphi %s881_s13, %s1062_s13   ;;  %s828_s12 = sphi %s879_s12, %s1061_s12  }
   0x8   : > { %p37_p0 = scmp.ge.s32.totalorder %s35_s18, 3  ;;  %p83_p1 = scmp.ne.s32.totalorder %s836_s14, %s832_s13 }
   0x9   : > { %p84_p2 = scmp.eq.s32.totalorder %s848_s17, 0  ;;  %p611_p4 = scmp.lt.s32.totalorder %s848_s17, 3 }
   0xa   : > { %s1067_s18 = smov (%p37_p0, %s35_s18), 0  ;;  %s185_s22 = sand.u32 1, %s848_s17  }
   0xb   : > { %p919_p3 = por %p84_p2, %p83_p1  ;;  %s72_s21 = ssub.s32 %s844_s16, %s1067_s18 }
   0xc   : > { %p74_p5 = scmp.eq.s32.totalorder %s72_s21, 0  ;;  %s187_s23 = sand.u32 1, %s836_s14  }
   0xd   : > { %s531_s24 = sshll.u32 %s844_s16, 2  ;;  %s530_s26 = sshll.u32 %s187_s23, 6 }
   0xe   : > { %s930_s25 = scalar_select %p74_p5, %s836_s14, %s76_s19  }
   0xf   : > { %s196_s29 = scalar_lea.hbm %s1052_s1, %s531_s24  ;;  %s189_s4 = scalar_lea.vmem [#allocation6], %s530_s26 }
  0x10   : > { %s197_s30 = sshll.u32 %s196_s29, 4  ;;  %s199_s5 = sshll.u32 %s189_s4, 4  ;;  %s198_s30 = int_to_ptr.hbm [resolvable:$true] %s197_s30  ;;  %s200_s5 = int_to_ptr.vmem [resolvable:$true] %s199_s5 }
  0x11   : > { %p941_p6 = pnand %p611_p4, %p919_p3  ;;  %s945_s7 = scalar_lea.sflag [#allocation7], %s185_s22 }
  0x12   : > { %s850_s8 = smov 192   ;;  %s851_s9 = smov 64  }
  0x13   : > { %s852_s10 = smov 4   ;;  %s951_s11 = sadd.s32 4294967295, %s848_s17  }
  0x14   : > { %602 = dma.hbm_to_vmem [thread:$0]  (!%p941_p6), %s198_s30, 1024, %s200_s5, %s945_s7, %s850_s8, %s851_s9, %s852_s10  }
  0x15   : > { %s526_s19 = sadd.s32 4294967294, %s848_s17   ;;  %p89_p7 = scmp.ne.s32.totalorder %s832_s13, %s828_s12 }
  0x16   : > { %p90_p8 = scmp.eq.s32.totalorder %s951_s11, 0  ;;  %p141_p9 = scmp.eq.s32.totalorder %s951_s11, 2 }
  0x17   : > { %p147_p10 = scmp.eq.s32.totalorder %s526_s19, 2  ;;  %p527_p12 = scmp.ge.s32.totalorder %s848_s17, 1 }
  0x18   : > { %p960_p11 = por %p90_p8, %p89_p7  ;;  %p968_p13 = por %p141_p9, %p83_p1 }
  0x19   : > { %p972_p0 = por %p147_p10, %p89_p7  ;;  %p154_p2 = scmp.lt.s32.totalorder %s848_s17, 4 }
  0x1a   : > { %s169_s27 = sshll.u32 %s1051_s0, 4  ;;  %s853_s29 = smov [#allocation3]   ;;  %s170_s27 = int_to_ptr.hbm [resolvable:$true] %s169_s27 }
  0x1b   : > { %p980_p3 = pnand %p527_p12, %p154_p2  ;;  %s171_s30 = sshll.u32 %s853_s29, 4  ;;  %s172_s30 = int_to_ptr.vmem [resolvable:$true] %s171_s30 }
  0x1c   : > { %s215_s8 = scalar_lea.hbm %s1053_s2, %s844_s16  ;;  %s212_s10 = scalar_lea.vmem [#allocation8], %s187_s23 }
  0x1d   : > { %p595_p1 = pneg %p980_p3  ;;  %s217_s9 = sshll.u32 %s215_s8, 4  ;;  %s218_s9 = int_to_ptr.hbm [resolvable:$true] %s217_s9 }
  0x1e   : > { %s219_s19 = sshll.u32 %s212_s10, 4  ;;  %s854_s24 = smov 128   ;;  %s220_s19 = int_to_ptr.vmem [resolvable:$true] %s219_s19 }
  0x1f   : > { %p596_p4 = pnand %p595_p1, %p90_p8  ;;  %s855_s26 = smov 8  }
  0x20   : > { %605 = dma.hbm_to_vmem [thread:$0]  (!%p941_p6), %s218_s9, 16, %s220_s19, %s945_s7  }
  0x21   : > { %598 = dma.hbm_to_vmem [thread:$0]  (!%p596_p4), %s170_s27, 256, %s172_s30, [#allocation4], %s854_s24, %s854_s24, %s855_s26  }
  0x22   : > { %228 = sbr.rel (%p980_p3) target bundleno = 219 (0xdb), region = 32 }
  0x27   : > { %815 = dma.done.wait (%p90_p8), [#allocation4], 256  }
  0x28   : > { %817 = vsyncadd (%p90_p8), [#allocation4], 4294967040  ;;  %s235_s23 = sand.u32 1, %s951_s11   ;;  %s1005_s29 = sand.u32 1, %s832_s13  }
  0x29   : > { %s534_s27 = sshll.u32 %s1005_s29, 6  ;;  %s236_s30 = scalar_lea.sflag [#allocation7], %s235_s23 }
  0x2a   : > { %s239_s6 = scalar_lea.vmem [#allocation6], %s534_s27 }
  0x2b   : > { %819 = dma.done.wait (%p960_p11), %s236_s30, 1040  }
  0x2c   : > { %821 = vsyncadd (%p960_p11), %s236_s30, 4294966256  ;;  %v579_v0 = vld [vmem:[%s239_s6 + $0x38] sm:$0xff]  ;;  %v578_v1 = vld [vmem:[%s239_s6 + $0x30] sm:$0xff]  ;;  %s248_s7 = scalar_lea.vmem [#allocation8], %s1005_s29  ;;  %s535_s11 = sshll.u32 %s1005_s29, 3 }
  0x2d   : > { %354 = vmatpush.bf16.msra.mxu0 %v579_v0  ;;  %v577_v2 = vld [vmem:[%s239_s6 + $0x28] sm:$0xff]  ;;  %v576_v3 = vld [vmem:[%s239_s6 + $0x20] sm:$0xff]  ;;  %v575_v4 = vld [vmem:[%s239_s6 + $0x18] sm:$0xff]  ;;  %s569_s20 = sshll.u32 %s840_s15, 2  ;;  %s275_s8 = scalar_lea.vmem [#allocation9], %s535_s11 }
  0x2e   : > { %v574_v5 = vld [vmem:[%s239_s6 + $0x10] sm:$0xff]  ;;  %v573_v6 = vld [vmem:[%s239_s6 + $0x8] sm:$0xff]  ;;  %v572_v7 = vld [vmem:[%s239_s6] sm:$0xff]  ;;  %s401_s5 = scalar_lea.hbm %s1054_s3, %s569_s20  ;;  %s402_s9 = sshll.u32 %s275_s8, 4  ;;  %s403_s9 = int_to_ptr.vmem [resolvable:$true] %s402_s9 }
  0x2f   : > { %v287_v8 = vld [vmem:[#allocation3] sm:$0xff]  ;;  %v288_v9 = vld [vmem:[#allocation3 + $0x8] sm:$0xff]  ;;  %s404_s10 = sshll.u32 %s401_s5, 4  ;;  %s388_s19 = scalar_lea.sflag [#allocation5], %s1005_s29  ;;  %s405_s10 = int_to_ptr.hbm [resolvable:$true] %s404_s10 }
  0x30   : > { %v289_v10 = vpack.c.bf16 %v288_v9, %v287_v8  ;;  %v671_v12 = vld [vmem:[%s248_s7] ss:$0 sm:$0xff]  ;;  %s776_s24 = sshra.s32 %s405_s10, 4  ;;  %s782_s27 = scalar_lea.hbm %s1054_s3, 24  ;;  %s777_s24 = int_to_ptr.hbm [resolvable:$true] %s776_s24 }
  0x31   : > { %355 = vmatpush.bf16.msra.mxu0 %v578_v1  ;;  %s778_s15 = scalar_lea.hbm %s777_s24, 8  ;;  %p783_p8 = scmp.lt.s32.totalorder %s777_s24, %s1054_s3 }
  0x32   : > { %p779_p5 = scmp.ne.s32.totalorder %s777_s24, %s778_s15  ;;  %p784_p9 = scmp.lt.s32.totalorder %s782_s27, %s778_s15 }
  0x34   : > { %p780_p6 = pnand %p779_p5, %p968_p13  ;;  %p785_p10 = por %p784_p9, %p783_p8 }
  0x35   : > { %356 = vmatpush.bf16.msra.mxu0 %v577_v2 }
  0x36   : > { %p781_p7 = pneg %p780_p6 }
  0x38   : > { %p786_p11 = pnand %p785_p10, %p781_p7 }
  0x39   : > { %357 = vmatpush.bf16.msra.mxu0 %v576_v3 }
  0x3d   : > { %358 = vmatpush.bf16.msra.mxu0 %v575_v4 }
  0x41   : > { %359 = vmatpush.bf16.msra.mxu0 %v574_v5 }
  0x45   : > { %360 = vmatpush.bf16.msra.mxu0 %v573_v6 }
  0x49   : > { %361 = vmatpush.bf16.msra.mxu0 %v572_v7 }
  0x4c   : > { %362 = vmatmul.bf16.vlgmr.msra.gmra.mxu0 %v289_v10 }
  0xc9   : > { %v363_v11 = vpop.f32.mrf.mxu0 }
  0xca   : > { %v381_v14 = vadd.f32 %v671_v12, %v363_v11 }
  0xd1   : > { %v365_v13 = vpop.f32.mrf.mxu0 }
  0xd2   : > { %v382_v15 = vadd.f32 %v671_v12, %v365_v13 }
  0xd4   : > { %v583_v16 = vpack.c.bf16 %v382_v15, %v381_v14 }
  0xd6   : > { %584 = vst [vmem:[%s275_s8] sm:$0xff] %v583_v16  }
  0xd7   : > { %789 = shalt.err (!%p786_p11)
}
  0xd8   : > { %s856_s29 = smov 64   ;;  %s857_s7 = smov 192  }
  0xd9   : > { %s858_s11 = smov 4  }
  0xda   : > { %593 = dma.vmem_to_hbm [thread:$0]  (%p968_p13), %s403_s9, 128, %s405_s10, %s388_s19, %s856_s29, %s857_s7, %s858_s11  }
  0xdb PF: > { %p613_p12 = scmp.ge.s32.totalorder %s848_s17, 2  ;;  %s419_s20 = sand.u32 1, %s828_s12  }
  0xdc   : > { %s420_s28 = scalar_lea.sflag [#allocation5], %s419_s20 }
  0xdd   : > { %p607_p2 = pnand %p613_p12, %p972_p0 }
  0xdf   : > { %p608_p3 = pneg %p607_p2 }
  0xe1   : > { %823 = dma.done.wait (%p608_p3), %s420_s28, 128  }
  0xe2   : > { %825 = vsyncadd (%p608_p3), %s420_s28, 4294967168  ;;  %s20_s17 = sadd.s32 1, %s848_s17   ;;  %s1061_s12 = smov %s832_s13 }
  0xe3   : > { %p17_p1 = scmp.ge.s32.totalorder %s20_s17, 5   ;;  %s1062_s13 = smov %s836_s14 }
  0xe4   : > { %s1063_s14 = smov %s930_s25  ;;  %s1064_s15 = smov %s844_s16 }
  0xe5   : > { %s1065_s16 = smov %s1067_s18  ;;  %19 = sbr.rel (!%p17_p1) target bundleno = 7 (0x7), region = 102 }
  0xea   :  { %426 = vsyncpa [#allocation4], 1 }
  0xeb   :  { %428 = vsyncpa [#allocation4 + $0x1], 1 }
  0xec   :  { %429 = vsyncpa [#allocation7], 1 }
  0xed   :  { %431 = vsyncpa [#allocation7 + $0x1], 1 }
  0xee   :  { %432 = vsyncpa [#allocation5], 1 }
  0xef   :  { %434 = vsyncpa [#allocation5 + $0x1], 1 }

</bundles_post_ra>
